<compile_context>
chip_gen: v7x
topology: tpu7x:2x2x1
jax: 0.10.0
libtpu: 0.0.40
codegen_flags: <defaults>
</compile_context>

<pallas_src>
import functools

import jax
import jax.numpy as jnp
from jax.experimental import pallas as pl
from jax.experimental.pallas import tpu as pltpu


# ----------------------------------------------------------------------------
# helpers
# ----------------------------------------------------------------------------
def _layernorm(x, gamma, beta, eps=1e-5):
    mean = jnp.mean(x, axis=-1, keepdims=True)
    var = jnp.mean((x - mean) ** 2, axis=-1, keepdims=True)
    return (x - mean) * jax.lax.rsqrt(var + eps) * gamma + beta


def _pick_batch_block(batch, t_pad, target_rows=256):
    """Largest divisor of `batch` whose flattened row count <= target."""
    cap = max(1, target_rows // t_pad)
    for cand in range(min(batch, cap), 0, -1):
        if batch % cand == 0:
            return cand
    return 1


# ----------------------------------------------------------------------------
# Pallas kernels
# ----------------------------------------------------------------------------
def patch_embed_kernel(p_ref, w_ref, b_ref, o_ref):
    # p: [tile, K] f32, w: [K, D] bf16, b: [1, D] f32
    o_ref[...] = (
        jnp.dot(p_ref[...].astype(jnp.bfloat16), w_ref[...],
                preferred_element_type=jnp.float32)
        + b_ref[...]
    )


def vit_blocks_kernel(x_ref, wqkv_ref, wo_ref, bo_ref,
                      g1_ref, b1_ref, g2_ref, b2_ref,
                      wf1_ref, bf1_ref, wf2_ref, bf2_ref,
                      o_ref, attn_ref, *, num_heads, seq_len):
    l = pl.program_id(1)

    # Layer 0: load the input activations into the resident output block.
    @pl.when(l == 0)
    def _():
        o_ref[...] = x_ref[...]

    x3 = o_ref[...]                          # [Bblk, T_pad, D]  (resident)
    bblk, t_pad, d = x3.shape
    n = bblk * t_pad
    hd = d // num_heads
    scale = float(hd) ** -0.5

    x = x3.reshape(n, d)                     # flatten B*T into matmul rows

    # ---- pre-LN multi-head self-attention ----
    xn = _layernorm(x, g1_ref[0], b1_ref[0])                       # f32
    qkv = jnp.dot(xn.astype(jnp.bfloat16), wqkv_ref[0],
                  preferred_element_type=jnp.float32)              # [n, 3D]
    q = qkv[:, :d]
    k = qkv[:, d:2 * d]
    v = qkv[:, 2 * d:]

    mask_keys = seq_len < t_pad
    if mask_keys:
        key_pos = jax.lax.broadcasted_iota(jnp.int32, (1, 1, t_pad), 2)

    for h in range(num_heads):
        sl = slice(h * hd, (h + 1) * hd)
        qh = q[:, sl].astype(jnp.bfloat16).reshape(bblk, t_pad, hd)
        kh = k[:, sl].astype(jnp.bfloat16).reshape(bblk, t_pad, hd)
        vh = v[:, sl].astype(jnp.bfloat16).reshape(bblk, t_pad, hd)

        att = jax.lax.dot_general(
            qh, kh, (((2,), (2,)), ((0,), (0,))),
            preferred_element_type=jnp.float32) * scale            # [Bblk,T,T]
        if mask_keys:
            att = jnp.where(key_pos < seq_len, att, jnp.float32(-1e30))
        att = att - jnp.max(att, axis=-1, keepdims=True)
        att = jnp.exp(att)
        att = att * pl.reciprocal(jnp.sum(att, axis=-1, keepdims=True),
                                  approx=True)
        oh = jax.lax.dot_general(
            att.astype(jnp.bfloat16), vh,
            (((2,), (1,)), ((0,), (0,))),
            preferred_element_type=jnp.float32)                    # [Bblk,T,hd]
        attn_ref[:, sl] = oh.reshape(n, hd)   # column-slice write, no concat

    proj = (jnp.dot(attn_ref[...].astype(jnp.bfloat16), wo_ref[0],
                    preferred_element_type=jnp.float32)
            + bo_ref[0])
    x = x + proj                                                   # residual

    # ---- pre-LN feed-forward ----
    xn2 = _layernorm(x, g2_ref[0], b2_ref[0])
    h1 = (jnp.dot(xn2.astype(jnp.bfloat16), wf1_ref[0],
                  preferred_element_type=jnp.float32)
          + bf1_ref[0])
    # TODO(synk): PyTorch nn.GELU default is exact (erf); tanh approx used here.
    h1 = jax.nn.gelu(h1, approximate=True)
    h2 = (jnp.dot(h1.astype(jnp.bfloat16), wf2_ref[0],
                  preferred_element_type=jnp.float32)
          + bf2_ref[0])
    x = x + h2                                                     # residual

    o_ref[...] = x.reshape(bblk, t_pad, d)


def final_ln_kernel(x_ref, g_ref, b_ref, o_ref):
    o_ref[...] = _layernorm(x_ref[...], g_ref[...], b_ref[...])


# ----------------------------------------------------------------------------
# wrappers around pallas_call
# ----------------------------------------------------------------------------
def patch_embed(patches, w_bf16, b, *, row_tile=256):
    N, K = patches.shape
    D = w_bf16.shape[1]
    tile = N if N <= row_tile else row_tile
    return pl.pallas_call(
        patch_embed_kernel,
        out_shape=jax.ShapeDtypeStruct((N, D), jnp.float32),
        grid=(pl.cdiv(N, tile),),
        in_specs=[
            pl.BlockSpec((tile, K), lambda i: (i, 0)),
            pl.BlockSpec((K, D), lambda i: (0, 0)),
            pl.BlockSpec((1, D), lambda i: (0, 0)),
        ],
        out_specs=pl.BlockSpec((tile, D), lambda i: (i, 0)),
        compiler_params=pltpu.CompilerParams(
            dimension_semantics=("parallel",)),
    )(patches, w_bf16, b)


def transformer_blocks(x_pad, p, *, num_heads, seq_len, batch_block):
    B, T_pad, D = x_pad.shape
    L = p["wqkv"].shape[0]
    F = p["wf1"].shape[2]
    nb = B // batch_block
    n_rows = batch_block * T_pad

    kern = functools.partial(vit_blocks_kernel,
                             num_heads=num_heads, seq_len=seq_len)

    def wspec(shape):
        # stacked weights: [L, ...]; fetch layer l's slice each step
        return pl.BlockSpec((1,) + shape, lambda b, l: (l, 0, 0))

    act_spec = pl.BlockSpec((batch_block, T_pad, D), lambda b, l: (b, 0, 0))

    return pl.pallas_call(
        kern,
        out_shape=jax.ShapeDtypeStruct((B, T_pad, D), jnp.float32),
        grid=(nb, L),                       # layer axis innermost / arbitrary
        in_specs=[
            act_spec,                       # x (only read at l == 0)
            wspec((D, 3 * D)),              # fused wqkv
            wspec((D, D)), wspec((1, D)),   # wo, bo
            wspec((1, D)), wspec((1, D)),   # ln1 gamma, beta
            wspec((1, D)), wspec((1, D)),   # ln2 gamma, beta
            wspec((D, F)), wspec((1, F)),   # mlp w1, b1
            wspec((F, D)), wspec((1, D)),   # mlp w2, b2
        ],
        out_specs=act_spec,                 # resident across the layer axis
        scratch_shapes=[pltpu.VMEM((n_rows, D), jnp.float32)],  # attn heads
        compiler_params=pltpu.CompilerParams(
            dimension_semantics=("parallel", "arbitrary"),
            vmem_limit_bytes=32 * 1024 * 1024,
        ),
    )(x_pad, p["wqkv"], p["wo"], p["bo"],
      p["g1"], p["b1"], p["g2"], p["b2"],
      p["wf1"], p["bf1"], p["wf2"], p["bf2"])


def final_layernorm(x, gamma, beta):
    return pl.pallas_call(
        final_ln_kernel,
        out_shape=jax.ShapeDtypeStruct(x.shape, jnp.float32),
    )(x, gamma, beta)


# ----------------------------------------------------------------------------
# parameter init (deterministic, synthetic).  Matmul weights in bf16 (stacked
# per-layer along a leading L axis); LN / bias params in f32.
# ----------------------------------------------------------------------------
def init_params(key, *, img_size, patch_size, num_hiddens, num_blks,
                in_channels):
    D = num_hiddens
    F = 4 * D
    NP = (img_size // patch_size) ** 2
    L = num_blks
    keys = jax.random.split(key, 6)

    def nrm(k, shape):
        return 0.02 * jax.random.normal(k, shape, jnp.float32)

    return {
        "conv_w": nrm(keys[0], (D, in_channels, patch_size, patch_size)),
        "conv_b": jnp.zeros((D,), jnp.float32),
        "cls_token": jnp.zeros((1, 1, D), jnp.float32),   # nn.Parameter(zeros)
        "pos_embedding": jax.random.normal(keys[1], (1, NP + 1, D),
                                           jnp.float32),
        "ln_g": jnp.ones((D,), jnp.float32),
        "ln_b": jnp.zeros((D,), jnp.float32),
        "blocks": {
            "wqkv": nrm(keys[2], (L, D, 3 * D)).astype(jnp.bfloat16),
            "wo": nrm(keys[3], (L, D, D)).astype(jnp.bfloat16),
            "bo": jnp.zeros((L, 1, D), jnp.float32),
            "g1": jnp.ones((L, 1, D), jnp.float32),
            "b1": jnp.zeros((L, 1, D), jnp.float32),
            "g2": jnp.ones((L, 1, D), jnp.float32),
            "b2": jnp.zeros((L, 1, D), jnp.float32),
            "wf1": nrm(keys[4], (L, D, F)).astype(jnp.bfloat16),
            "bf1": jnp.zeros((L, 1, F), jnp.float32),
            "wf2": nrm(keys[5], (L, F, D)).astype(jnp.bfloat16),
            "bf2": jnp.zeros((L, 1, D), jnp.float32),
        },
    }


# ----------------------------------------------------------------------------
# full forward
# ----------------------------------------------------------------------------
def vit_forward(X, params, *, patch_size, num_heads):
    B, C, H, W = X.shape
    P = patch_size
    Hp, Wp = H // P, W // P
    NP = Hp * Wp
    D = params["conv_w"].shape[0]
    T = NP + 1
    T_pad = ((T + 7) // 8) * 8

    # patch extraction (glue) — Conv2d(k=s=P) + flatten(2) + transpose(1,2)
    patches = (X.reshape(B, C, Hp, P, Wp, P)
                 .transpose(0, 2, 4, 1, 3, 5)
                 .reshape(B * NP, C * P * P))
    w_flat = params["conv_w"].reshape(D, C * P * P).T.astype(jnp.bfloat16)
    emb = patch_embed(patches, w_flat, params["conv_b"].reshape(1, D))
    emb = emb.reshape(B, NP, D)

    cls = jnp.broadcast_to(params["cls_token"], (B, 1, D))
    x = jnp.concatenate([cls, emb], axis=1) + params["pos_embedding"]
    # emb_dropout / blk_dropout: identity (eval mode)

    # pad sequence to a sublane-aligned length; padded keys masked in-kernel
    if T_pad > T:
        x = jnp.pad(x, ((0, 0), (0, T_pad - T), (0, 0)))

    bblk = _pick_batch_block(B, T_pad)
    x = transformer_blocks(x, params["blocks"], num_heads=num_heads,
                           seq_len=T, batch_block=bblk)

    cls_out = x[:, 0, :]                                        # [B, D]
    return final_layernorm(cls_out,
                           params["ln_g"].reshape(1, D),
                           params["ln_b"].reshape(1, D))


# ----------------------------------------------------------------------------
if __name__ == "__main__":
    img_size = 16
    patch_size = 4
    num_hiddens = 32
    num_heads = 4
    num_blks = 2
    in_channels = 3
    batch = 2

    key = jax.random.PRNGKey(0)
    kx, kp = jax.random.split(key)
    X = jax.random.normal(kx, (batch, in_channels, img_size, img_size),
                          jnp.float32)
    params = init_params(kp, img_size=img_size, patch_size=patch_size,
                         num_hiddens=num_hiddens, num_blks=num_blks,
                         in_channels=in_channels)

    out = vit_forward(X, params, patch_size=patch_size, num_heads=num_heads)
    out = jax.block_until_ready(out)
    assert out.shape == (batch, num_hiddens), out.shape
    print("KERNEL_OK")
</pallas_src>

<mosaic_0001>
module attributes {stable_mosaic.version = 11 : i64} {
  func.func @patch_embed_kernel(%arg0: i32, %arg1: memref<32x48xf32, #tpu.memory_space<vmem>>, %arg2: memref<48x32xbf16, #tpu.memory_space<vmem>>, %arg3: memref<1x32xf32, #tpu.memory_space<vmem>>, %arg4: memref<32x32xf32, #tpu.memory_space<vmem>>) attributes {dimension_semantics = [#tpu.dimension_semantics<parallel>], iteration_bounds = array<i64: 1>, scalar_prefetch = 0 : i64, scratch_operands = 0 : i64, tpu.core_type = #tpu.core_type<tc>, window_params = [{transform_indices = @transform_0, window_bounds = array<i64: 32, 48>}, {pipeline_mode = #tpu.pipeline_mode<synchronous>, transform_indices = @transform_1, window_bounds = array<i64: 48, 32>}, {pipeline_mode = #tpu.pipeline_mode<synchronous>, transform_indices = @transform_2, window_bounds = array<i64: 1, 32>}, {transform_indices = @transform_3, window_bounds = array<i64: 32, 32>}]} {
    %c0 = arith.constant 0 : index
    %c0_0 = arith.constant 0 : index
    %0 = vector.load %arg1[%c0, %c0_0] : memref<32x48xf32, #tpu.memory_space<vmem>>, vector<32x48xf32>
    %1 = arith.truncf %0 : vector<32x48xf32> to vector<32x48xbf16>
    %c0_1 = arith.constant 0 : index
    %c0_2 = arith.constant 0 : index
    %2 = vector.load %arg2[%c0_1, %c0_2] : memref<48x32xbf16, #tpu.memory_space<vmem>>, vector<48x32xbf16>
    %cst = arith.constant dense<0.000000e+00> : vector<32x32xf32>
    %3 = tpu.matmul %1, %2, %cst {dimension_numbers = #tpu.dot_dimension_numbers<[1], [0], [0], [1], [0, 0, 1, 1], [], []>} : vector<32x48xbf16>, vector<48x32xbf16>, vector<32x32xf32> -> vector<32x32xf32>
    %c0_3 = arith.constant 0 : index
    %c0_4 = arith.constant 0 : index
    %4 = vector.load %arg3[%c0_3, %c0_4] : memref<1x32xf32, #tpu.memory_space<vmem>>, vector<1x32xf32>
    %5 = vector.broadcast %4 : vector<1x32xf32> to vector<32x32xf32>
    %6 = arith.addf %3, %5 : vector<32x32xf32>
    %c0_5 = arith.constant 0 : index
    %c0_6 = arith.constant 0 : index
    %7 = vector.load %arg4[%c0_5, %c0_6] : memref<32x32xf32, #tpu.memory_space<vmem>>, vector<32x32xf32>
    tpu.vector_store %arg4[%c0_5, %c0_6], %6 {strides = array<i32>} : memref<32x32xf32, #tpu.memory_space<vmem>>, vector<32x32xf32>,
    return
  }
  func.func @transform_0(%arg0: i32) -> (i32, i32) {
    %c0_i32 = arith.constant 0 : i32
    %c0_i32_0 = arith.constant 0 : i32
    return %arg0, %c0_i32 : i32, i32
  }
  func.func @transform_1(%arg0: i32) -> (i32, i32) {
    %c0_i32 = arith.constant 0 : i32
    %c0_i32_0 = arith.constant 0 : i32
    %c0_i32_1 = arith.constant 0 : i32
    return %c0_i32, %c0_i32_0 : i32, i32
  }
  func.func @transform_2(%arg0: i32) -> (i32, i32) {
    %c0_i32 = arith.constant 0 : i32
    %c0_i32_0 = arith.constant 0 : i32
    %c0_i32_1 = arith.constant 0 : i32
    return %c0_i32, %c0_i32_0 : i32, i32
  }
  func.func @transform_3(%arg0: i32) -> (i32, i32) {
    %c0_i32 = arith.constant 0 : i32
    %c0_i32_0 = arith.constant 0 : i32
    return %arg0, %c0_i32 : i32, i32
  }
}

</mosaic_0001>

<bundles_post_ra>
// kernel: tpu_custom_call.1
= control target key start
LH: loop header
LB: loop body
LE: loop exit
PB: predicated region body
PF: predicated region fallthrough
CT: control target
= control target key end

     0   :  { %vm53_vm0 = vcmask 392192   ;;  %s240_s0 = inlined_call_operand.vmem [shape: f32[32,48], index: 0, kind: input, shape index: {}]   ;;  %s241_s1 = inlined_call_operand.vmem [shape: bf16[48,32], index: 1, kind: input, shape index: {}]   ;;  %s242_s2 = inlined_call_operand.vmem [shape: f32[1,32], index: 2, kind: input, shape index: {}]   ;;  %s243_s3 = inlined_call_operand.hbm [shape: f32[32,32], index: 3, kind: output, shape index: {}]  }
   0x1   :  { %v154_v0 = vld [vmem:[%s241_s1] sm:$0xff]   ;;  %v155_v1 = vld [vmem:[%s241_s1 + $0x8] sm:$0xff]   ;;  %v156_v4 = vld [vmem:[%s241_s1 + $0x10] sm:$0xff]  }
   0x2   :  { %141 = vmatprep.subr.bf16.mxu0 %v154_v0  ;;  %v16_v2 = vld [vmem:[%s240_s0] sm:$0xff]  ;;  %v17_v3 = vld [vmem:[%s240_s0 + $0x8] sm:$0xff] }
   0x3   :  { %142 = vmatpush3.bf16.msra.mxu0 %v154_v0  ;;  %v20_v5 = vpack.c.bf16 %v17_v3, %v16_v2 }
   0x4   :  { %143 = vmatprep.subr.bf16.mxu0 %v155_v1 }
   0x5   :  { %8 = vsyncpa [#allocation3], 0  ;;  %147 = vmatprep.mubr.msk.bf16.mxu0 %vm53_vm0, %v20_v5  ;;  %v18_v6 = vld [vmem:[%s240_s0 + $0x10] sm:$0xff]  ;;  %v19_v7 = vld [vmem:[%s240_s0 + $0x18] sm:$0xff]  ;;  %vm109_vm1 = vcmask 261120   ;;  %s181_s1 = smov [#allocation2]  }
   0x6   :  { %v21_v8 = vpack.c.bf16 %v19_v7, %v18_v6  ;;  %v130_v9 = vld [vmem:[%s242_s2] ss:$0 sm:$0xff]  ;;  %s119_s28 = sshll.u32 %s181_s1, 4  ;;  %s120_s28 = int_to_ptr.vmem [resolvable:$true] %s119_s28 }
   0x7   :  { %144 = vmatpush3.bf16.msra.mxu0 %v155_v1  ;;  %s157_s0 = scalar_lea.vmem %s120_s28, 512  ;;  %p162_p1 = scmp.lt.s32.totalorder %s120_s28, %s120_s28 }
   0x8   :  { %145 = vmatprep.subr.bf16.mxu0 %v156_v4  ;;  %p158_p0 = scmp.ne.s32.totalorder %s120_s28, %s157_s0  ;;  %p163_p2 = scmp.lt.s32.totalorder %s157_s0, %s157_s0 }
   0xa   :  { %p164_p3 = por %p163_p2, %p162_p1 }
   0xb   :  { %146 = vmatpush3.bf16.msra.mxu0 %v156_v4 }
   0xc   :  { %p165_p4 = pnand %p164_p3, %p158_p0 }
   0xe   :  { %148 = vmatmul.mubr.msk.bf16.vlgmr.msra.gmra.mrb[0].mxu0 %vm53_vm0, %v21_v8 }
  0xe1   :  { %v149_v10 = vpop.f32.mrb[0].mxu0 }
  0xe2   :  { %v103_v11 = vadd.f32 %v149_v10, %v130_v9  ;;  %v94_v12 = vpop.f32.mrb[1].mxu0 }
  0xe3   :  { %v95_v13 = vadd.f32 %v130_v9, %v94_v12  ;;  %v150_v14 = vpop.f32.mrb[2].mxu0 }
  0xe4   :  { %112 = vst.msk [vmem:[#allocation2 + $0x10] sm:$0xff] %vm109_vm1, %v103_v11  ;;  %v106_v15 = vadd.f32 %v150_v14, %v130_v9  ;;  %v97_v16 = vpop.f32.mrb[3].mxu0 }
  0xe5   :  { %110 = vst.msk [vmem:[#allocation2] sm:$0xff] %vm109_vm1, %v95_v13  ;;  %v98_v17 = vadd.f32 %v130_v9, %v97_v16 }
  0xe6   :  { %113 = vst.msk [vmem:[#allocation2 + $0x18] sm:$0xff] %vm109_vm1, %v106_v15 }
  0xe7   :  { %111 = vst.msk [vmem:[#allocation2 + $0x8] sm:$0xff] %vm109_vm1, %v98_v17 }
  0xe8   :  { %168 = shalt.err (!%p165_p4)
}
  0xe9   :  { %s169_s30 = scalar_lea.hbm %s243_s3, 512 }
  0xea   :  { %p170_p5 = scmp.ne.s32.totalorder %s243_s3, %s169_s30  ;;  %p173_p6 = scmp.lt.u32.totalorder %s169_s30, %s243_s3 }
  0xec   :  { %p175_p7 = pnand %p173_p6, %p170_p5 }
  0xee   :  { %178 = shalt.err (!%p175_p7)
}
  0xef   :  { %s182_s8 = smov 128   ;;  %s183_s9 = smov 8  }
  0xf0   :  { %125 = dma.vmem_to_hbm [thread:$0]  %s120_s28, 512, %s243_s3, [#allocation3], %s182_s8, %s182_s8, %s183_s9  }
  0xf1   :  { %179 = dma.done.wait [#allocation3], 512  }
  0xf2   :  { %180 = vsyncadd [#allocation3], 4294966784 }
  0xf3   :  { %129 = vsyncpa [#allocation3], 1 }

</bundles_post_ra>
